<compile_context>
chip_gen: v7x
topology: tpu7x:2x2x1
jax: 0.10.0
libtpu: 0.0.40
codegen_flags: <defaults>
</compile_context>

<pallas_src>
import jax
import jax.numpy as jnp
from jax import lax
from jax.experimental import pallas as pl
from jax.experimental.pallas import tpu as pltpu

N_CLASS = 20
N_FEAT = 10
HIDDEN = 10
N_CLASS_PAD = 32     # class axis padded to a sublane multiple for the aligned
                     # in-kernel transpose; padded rows get a -1e30 bias.

# Max batch rows per grid step.  Batch-major blocks pad the feature axis to
# 128 lanes in VMEM (512 B / row for f32), so 4096 rows =>
#   x block 2 MiB * 2 (double buffer) + out block 2 MiB * 2 + ~8 MiB of
#   intermediates  ~= 17 MiB  << 48 MiB scoped VMEM on v5e / v6e / v7x.
TILE_B_MAX = 4096


def _round_up(n, m):
    return ((n + m - 1) // m) * m


def _choose_tile_b(B, tile_b=None):
    if tile_b is None:
        # Aim for >= 2 grid steps when B is large enough so the "parallel"
        # batch axis actually uses both TensorCores on v7x.
        tile_b = _round_up(pl.cdiv(B, 2), 128)
    tile_b = min(int(tile_b), TILE_B_MAX)
    tile_b = max(128, _round_up(tile_b, 128))        # keep blocks (8,128)-aligned
    return min(tile_b, max(128, _round_up(B, 128)))  # no wider than the batch


def _mlp_softmax_kernel(x_ref, w1_ref, b1_ref, w2_ref, b2_ref, w3_ref, b3_ref,
                        o_ref):
    """Fused forward for one batch tile.

    x_ref:  (TILE_B, N_FEAT)          natural batch-major layout from HBM
    w1/w2:  (out, in); b1/b2: (out, 1)
    w3_ref: (N_CLASS_PAD, HIDDEN); b3_ref: (N_CLASS_PAD, 1), padded rows -1e30
    o_ref:  (TILE_B, N_CLASS)         batch-major output block
    """
    x = x_ref[...]                                           # (TB, 10)

    # L1 + ReLU.  MXU absorbs the input transpose: contract w1's "in" axis with
    # x's feature axis -> (HIDDEN, TB) feature-major (batch on the lane axis).
    h = lax.dot_general(w1_ref[...], x, (((1,), (1,)), ((), ())),
                        preferred_element_type=jnp.float32)
    h = jnp.maximum(h + b1_ref[...], 0.0)                    # lane-dense relu

    # L2 + ReLU (feature-major).
    h = jnp.dot(w2_ref[...], h, preferred_element_type=jnp.float32)
    h = jnp.maximum(h + b2_ref[...], 0.0)

    # L3 (feature-major, class axis padded to 32).
    logits = jnp.dot(w3_ref[...], h, preferred_element_type=jnp.float32)
    logits = logits + b3_ref[...]                            # padded rows ~ -1e30

    # Softmax over the class (sublane) axis; one softmax per batch column.
    m = jnp.max(logits, axis=0, keepdims=True)               # (1, TB)
    e = jnp.exp(logits - m)                                  # padded rows -> 0
    denom = jnp.sum(e, axis=0, keepdims=True)                # (1, TB)
    probs = e / denom                                        # exact normalization

    # Single XLU transpose to batch-major right before the store.  Aligned:
    # N_CLASS_PAD % 8 == 0 and TILE_B % 128 == 0.  Only real classes stored.
    probs_bm = jnp.transpose(probs)                          # (TB, N_CLASS_PAD)
    o_ref[...] = probs_bm[:, :N_CLASS].astype(o_ref.dtype)


def multilabel_linear_forward(x, params, tile_b=None):
    """x: (B, N_FEAT) float32.  Returns softmax probabilities (B, N_CLASS)."""
    B = x.shape[0]
    tile_b = _choose_tile_b(B, tile_b)
    grid = (pl.cdiv(B, tile_b),)

    # Pad the class axis of L3 (tiny host-side prep: 32x10 / 32x1).  Padded
    # rows get a very negative bias so exp() underflows to exactly 0.
    w3p = jnp.zeros((N_CLASS_PAD, HIDDEN), jnp.float32).at[:N_CLASS].set(params["w3"])
    b3p = jnp.full((N_CLASS_PAD, 1), -1e30, jnp.float32).at[:N_CLASS].set(params["b3"])

    def batch_spec(feat):
        return pl.BlockSpec((tile_b, feat), lambda i: (i, 0))

    def const_spec(shape):
        # Constant block index -> weights/biases stay VMEM-resident across grid.
        return pl.BlockSpec(shape, lambda i: (0, 0))

    flops = 2 * B * (N_FEAT * HIDDEN + HIDDEN * HIDDEN + HIDDEN * N_CLASS_PAD)
    bytes_accessed = 4 * (
        B * (N_FEAT + N_CLASS)
        + HIDDEN * (N_FEAT + 1) + HIDDEN * (HIDDEN + 1) + N_CLASS_PAD * (HIDDEN + 1)
    )

    return pl.pallas_call(
        _mlp_softmax_kernel,
        out_shape=jax.ShapeDtypeStruct((B, N_CLASS), jnp.float32),
        grid=grid,
        in_specs=[
            batch_spec(N_FEAT),                 # x, natural (B, N_FEAT) layout
            const_spec((HIDDEN, N_FEAT)),       # w1
            const_spec((HIDDEN, 1)),            # b1
            const_spec((HIDDEN, HIDDEN)),       # w2
            const_spec((HIDDEN, 1)),            # b2
            const_spec((N_CLASS_PAD, HIDDEN)),  # w3 (class-padded)
            const_spec((N_CLASS_PAD, 1)),       # b3 (class-padded)
        ],
        out_specs=batch_spec(N_CLASS),
        compiler_params=pltpu.CompilerParams(
            dimension_semantics=("parallel",),   # batch tiles across TCs on v7x
            vmem_limit_bytes=48 * 1024 * 1024,   # <= ~48 MiB: safe on v7x's 64 MiB
        ),
        cost_estimate=pl.CostEstimate(
            flops=flops,
            transcendentals=B * N_CLASS_PAD,
            bytes_accessed=bytes_accessed,
        ),
    )(x, params["w1"], params["b1"], params["w2"], params["b2"], w3p, b3p)


def init_params(key):
    """PyTorch nn.Linear-style init (U[-1/sqrt(in), 1/sqrt(in)]).

    Weights stored as (out, in) like torch; biases as (out, 1) so they
    broadcast over the lane (batch) axis inside the kernel.
    """
    def linear(k, fan_in, fan_out):
        kw, kb = jax.random.split(k)
        bound = 1.0 / jnp.sqrt(jnp.float32(fan_in))
        w = jax.random.uniform(kw, (fan_out, fan_in), jnp.float32, -bound, bound)
        b = jax.random.uniform(kb, (fan_out, 1), jnp.float32, -bound, bound)
        return w, b

    k1, k2, k3 = jax.random.split(key, 3)
    w1, b1 = linear(k1, N_FEAT, HIDDEN)
    w2, b2 = linear(k2, HIDDEN, HIDDEN)
    w3, b3 = linear(k3, HIDDEN, N_CLASS)
    return {"w1": w1, "b1": b1, "w2": w2, "b2": b2, "w3": w3, "b3": b3}


def reference_forward(x, p):
    h = jnp.maximum(x @ p["w1"].T + p["b1"].T, 0.0)
    h = jnp.maximum(h @ p["w2"].T + p["b2"].T, 0.0)
    logits = h @ p["w3"].T + p["b3"].T
    return jax.nn.softmax(logits, axis=-1)


if __name__ == "__main__":
    key = jax.random.PRNGKey(0)
    kx, kp, kx2 = jax.random.split(key, 3)
    params = init_params(kp)

    # Small shape consistent with the module (single, partially-filled tile).
    batch = 8
    x = jax.random.normal(kx, (batch, N_FEAT), dtype=jnp.float32)
    out = jax.block_until_ready(multilabel_linear_forward(x, params))
    ref = reference_forward(x, params)
    assert out.shape == (batch, N_CLASS)
    assert jnp.allclose(out, ref, atol=2e-3, rtol=2e-3)
    assert jnp.allclose(jnp.sum(out, axis=-1), 1.0, atol=2e-3)

    # Multi-step grid with a ragged (masked) edge tile: 300 = 2*128 + 44.
    batch2 = 300
    x2 = jax.random.normal(kx2, (batch2, N_FEAT), dtype=jnp.float32)
    out2 = jax.block_until_ready(multilabel_linear_forward(x2, params, tile_b=128))
    ref2 = reference_forward(x2, params)
    assert out2.shape == (batch2, N_CLASS)
    assert jnp.allclose(out2, ref2, atol=2e-3, rtol=2e-3)
    assert jnp.allclose(jnp.sum(out2, axis=-1), 1.0, atol=2e-3)

    # Auto tile selection path (2 grid steps: 256 + ragged 44).
    out3 = jax.block_until_ready(multilabel_linear_forward(x2, params))
    assert jnp.allclose(out3, ref2, atol=2e-3, rtol=2e-3)

    print("KERNEL_OK")
</pallas_src>

<mosaic_0001>
module attributes {stable_mosaic.version = 11 : i64} {
  func.func @_mlp_softmax_kernel(%arg0: i32, %arg1: memref<128x10xf32, #tpu.memory_space<vmem>>, %arg2: memref<10x10xf32, #tpu.memory_space<vmem>>, %arg3: memref<10x1xf32, #tpu.memory_space<vmem>>, %arg4: memref<10x10xf32, #tpu.memory_space<vmem>>, %arg5: memref<10x1xf32, #tpu.memory_space<vmem>>, %arg6: memref<32x10xf32, #tpu.memory_space<vmem>>, %arg7: memref<32x1xf32, #tpu.memory_space<vmem>>, %arg8: memref<128x20xf32, #tpu.memory_space<vmem>>) attributes {dimension_semantics = [#tpu.dimension_semantics<parallel>], iteration_bounds = array<i64: 1>, scalar_prefetch = 0 : i64, scratch_operands = 0 : i64, tpu.core_type = #tpu.core_type<tc>, window_params = [{transform_indices = @transform_0, window_bounds = array<i64: 128, 10>}, {pipeline_mode = #tpu.pipeline_mode<synchronous>, transform_indices = @transform_1, window_bounds = array<i64: 10, 10>}, {pipeline_mode = #tpu.pipeline_mode<synchronous>, transform_indices = @transform_2, window_bounds = array<i64: 10, 1>}, {pipeline_mode = #tpu.pipeline_mode<synchronous>, transform_indices = @transform_3, window_bounds = array<i64: 10, 10>}, {pipeline_mode = #tpu.pipeline_mode<synchronous>, transform_indices = @transform_4, window_bounds = array<i64: 10, 1>}, {pipeline_mode = #tpu.pipeline_mode<synchronous>, transform_indices = @transform_5, window_bounds = array<i64: 32, 10>}, {pipeline_mode = #tpu.pipeline_mode<synchronous>, transform_indices = @transform_6, window_bounds = array<i64: 32, 1>}, {transform_indices = @transform_7, window_bounds = array<i64: 128, 20>}]} {
    %c0 = arith.constant 0 : index
    %c0_0 = arith.constant 0 : index
    %0 = vector.load %arg1[%c0, %c0_0] : memref<128x10xf32, #tpu.memory_space<vmem>>, vector<128x10xf32>
    %c0_1 = arith.constant 0 : index
    %c0_2 = arith.constant 0 : index
    %1 = vector.load %arg2[%c0_1, %c0_2] : memref<10x10xf32, #tpu.memory_space<vmem>>, vector<10x10xf32>
    %cst = arith.constant dense<0.000000e+00> : vector<10x128xf32>
    %2 = tpu.matmul %1, %0, %cst {dimension_numbers = #tpu.dot_dimension_numbers<[1], [1], [0], [0], [0, 0, 1, 0], [], []>} : vector<10x10xf32>, vector<128x10xf32>, vector<10x128xf32> -> vector<10x128xf32>
    %c0_3 = arith.constant 0 : index
    %c0_4 = arith.constant 0 : index
    %3 = vector.load %arg3[%c0_3, %c0_4] : memref<10x1xf32, #tpu.memory_space<vmem>>, vector<10x1xf32>
    %4 = vector.broadcast %3 : vector<10x1xf32> to vector<10x128xf32>
    %5 = arith.addf %2, %4 : vector<10x128xf32>
    %cst_5 = arith.constant 0.000000e+00 : f32
    %6 = vector.broadcast %cst_5 : f32 to vector<10x128xf32>
    %7 = arith.maximumf %5, %6 : vector<10x128xf32>
    %c0_6 = arith.constant 0 : index
    %c0_7 = arith.constant 0 : index
    %8 = vector.load %arg4[%c0_6, %c0_7] : memref<10x10xf32, #tpu.memory_space<vmem>>, vector<10x10xf32>
    %cst_8 = arith.constant dense<0.000000e+00> : vector<10x128xf32>
    %9 = tpu.matmul %8, %7, %cst_8 {dimension_numbers = #tpu.dot_dimension_numbers<[1], [0], [0], [1], [0, 0, 1, 1], [], []>} : vector<10x10xf32>, vector<10x128xf32>, vector<10x128xf32> -> vector<10x128xf32>
    %c0_9 = arith.constant 0 : index
    %c0_10 = arith.constant 0 : index
    %10 = vector.load %arg5[%c0_9, %c0_10] : memref<10x1xf32, #tpu.memory_space<vmem>>, vector<10x1xf32>
    %11 = vector.broadcast %10 : vector<10x1xf32> to vector<10x128xf32>
    %12 = arith.addf %9, %11 : vector<10x128xf32>
    %cst_11 = arith.constant 0.000000e+00 : f32
    %13 = vector.broadcast %cst_11 : f32 to vector<10x128xf32>
    %14 = arith.maximumf %12, %13 : vector<10x128xf32>
    %c0_12 = arith.constant 0 : index
    %c0_13 = arith.constant 0 : index
    %15 = vector.load %arg6[%c0_12, %c0_13] : memref<32x10xf32, #tpu.memory_space<vmem>>, vector<32x10xf32>
    %cst_14 = arith.constant dense<0.000000e+00> : vector<32x128xf32>
    %16 = tpu.matmul %15, %14, %cst_14 {dimension_numbers = #tpu.dot_dimension_numbers<[1], [0], [0], [1], [0, 0, 1, 1], [], []>} : vector<32x10xf32>, vector<10x128xf32>, vector<32x128xf32> -> vector<32x128xf32>
    %c0_15 = arith.constant 0 : index
    %c0_16 = arith.constant 0 : index
    %17 = vector.load %arg7[%c0_15, %c0_16] : memref<32x1xf32, #tpu.memory_space<vmem>>, vector<32x1xf32>
    %18 = vector.broadcast %17 : vector<32x1xf32> to vector<32x128xf32>
    %19 = arith.addf %16, %18 : vector<32x128xf32>
    %cst_17 = arith.constant dense<0xFF800000> : vector<128xf32>
    %20 = vector.multi_reduction <maximumf>, %19, %cst_17 [0] : vector<32x128xf32> to vector<128xf32>
    %21 = vector.shape_cast %20 : vector<128xf32> to vector<1x128xf32>
    %22 = vector.broadcast %21 : vector<1x128xf32> to vector<32x128xf32>
    %23 = arith.subf %19, %22 : vector<32x128xf32>
    %24 = math.exp %23 : vector<32x128xf32>
    %cst_18 = arith.constant dense<0.000000e+00> : vector<128xf32>
    %25 = vector.multi_reduction <add>, %24, %cst_18 [0] : vector<32x128xf32> to vector<128xf32>
    %26 = vector.shape_cast %25 : vector<128xf32> to vector<1x128xf32>
    %27 = vector.broadcast %26 : vector<1x128xf32> to vector<32x128xf32>
    %28 = arith.divf %24, %27 : vector<32x128xf32>
    %29 = tpu.transpose %28, [1, 0] : vector<32x128xf32> -> vector<128x32xf32>
    %30 = vector.extract_strided_slice %29 {offsets = [0, 0], sizes = [128, 20], strides = [1, 1]} : vector<128x32xf32> to vector<128x20xf32>
    %c0_19 = arith.constant 0 : index
    %c0_20 = arith.constant 0 : index
    %31 = vector.load %arg8[%c0_19, %c0_20] : memref<128x20xf32, #tpu.memory_space<vmem>>, vector<128x20xf32>
    tpu.vector_store %arg8[%c0_19, %c0_20], %30 {strides = array<i32>} : memref<128x20xf32, #tpu.memory_space<vmem>>, vector<128x20xf32>,
    return
  }
  func.func @transform_0(%arg0: i32) -> (i32, i32) {
    %c0_i32 = arith.constant 0 : i32
    %c0_i32_0 = arith.constant 0 : i32
    return %arg0, %c0_i32 : i32, i32
  }
  func.func @transform_1(%arg0: i32) -> (i32, i32) {
    %c0_i32 = arith.constant 0 : i32
    %c0_i32_0 = arith.constant 0 : i32
    %c0_i32_1 = arith.constant 0 : i32
    return %c0_i32, %c0_i32_0 : i32, i32
  }
  func.func @transform_2(%arg0: i32) -> (i32, i32) {
    %c0_i32 = arith.constant 0 : i32
    %c0_i32_0 = arith.constant 0 : i32
    %c0_i32_1 = arith.constant 0 : i32
    return %c0_i32, %c0_i32_0 : i32, i32
  }
  func.func @transform_3(%arg0: i32) -> (i32, i32) {
    %c0_i32 = arith.constant 0 : i32
    %c0_i32_0 = arith.constant 0 : i32
    %c0_i32_1 = arith.constant 0 : i32
    return %c0_i32, %c0_i32_0 : i32, i32
  }
  func.func @transform_4(%arg0: i32) -> (i32, i32) {
    %c0_i32 = arith.constant 0 : i32
    %c0_i32_0 = arith.constant 0 : i32
    %c0_i32_1 = arith.constant 0 : i32
    return %c0_i32, %c0_i32_0 : i32, i32
  }
  func.func @transform_5(%arg0: i32) -> (i32, i32) {
    %c0_i32 = arith.constant 0 : i32
    %c0_i32_0 = arith.constant 0 : i32
    %c0_i32_1 = arith.constant 0 : i32
    return %c0_i32, %c0_i32_0 : i32, i32
  }
  func.func @transform_6(%arg0: i32) -> (i32, i32) {
    %c0_i32 = arith.constant 0 : i32
    %c0_i32_0 = arith.constant 0 : i32
    %c0_i32_1 = arith.constant 0 : i32
    return %c0_i32, %c0_i32_0 : i32, i32
  }
  func.func @transform_7(%arg0: i32) -> (i32, i32) {
    %c0_i32 = arith.constant 0 : i32
    %c0_i32_0 = arith.constant 0 : i32
    return %arg0, %c0_i32 : i32, i32
  }
}

</mosaic_0001>

<bundles_post_ra>
// kernel: tpu_custom_call.1
= control target key start
LH: loop header
LB: loop body
LE: loop exit
PB: predicated region body
PF: predicated region fallthrough
CT: control target
= control target key end

     0   :  { %12 = vsyncpa [#allocation3], 0  ;;  %vm57_vm0 = vcmask 80896   ;;  %v726_v6 = vmov 0   ;;  %vm209_vm2 = vcmask 1041408   ;;  %vm727_vm3 = vmmov 1   ;;  %s953_s0 = inlined_call_operand.vmem [shape: f32[8,10], index: 0, kind: input, shape index: {}]   ;;  %s954_s1 = inlined_call_operand.vmem [shape: f32[10,10], index: 1, kind: input, shape index: {}]   ;;  %s955_s2 = inlined_call_operand.vmem [shape: f32[10,1], index: 2, kind: input, shape index: {}]   ;;  %s956_s3 = inlined_call_operand.vmem [shape: f32[10,10], index: 3, kind: input, shape index: {}]   ;;  %s957_s4 = inlined_call_operand.vmem [shape: f32[10,1], index: 4, kind: input, shape index: {}]   ;;  %s958_s5 = inlined_call_operand.vmem [shape: f32[32,10], index: 5, kind: input, shape index: {}]   ;;  %s959_s6 = inlined_call_operand.vmem [shape: f32[32,1], index: 6, kind: input, shape index: {}]   ;;  %s960_s7 = inlined_call_operand.hbm [shape: f32[8,20], index: 7, kind: output, shape index: {}]  }
   0x1   :  { %v27_v0 = vld [vmem:[%s953_s0] sm:$0xff]  ;;  %v28_v1 = vld [vmem:[%s953_s0 + $0x8] sm:$0xff]  ;;  %vm779_vm1 = vmpackc.low %vm57_vm0, %vm57_vm0  ;;  %690 = vset.pattern.permute.xlu0 %v726_v6  ;;  %691 = vset.pattern.permute.xlu1 %v726_v6  ;;  %vm485_vm5 = vcmask 162816  }
   0x2   :  { %v624_v2 = vpack.c.bf16 %v28_v1, %v27_v0  ;;  %v29_v4 = vld [vmem:[%s953_s0 + $0x10] sm:$0xff]  ;;  %v30_v5 = vld [vmem:[%s953_s0 + $0x18] sm:$0xff]  ;;  %v31_v8 = vld [vmem:[%s953_s0 + $0x20] sm:$0xff] }
   0x3   :  { %v630_v7 = vpack.c.bf16 %v30_v5, %v29_v4  ;;  %v32_v9 = vld [vmem:[%s953_s0 + $0x28] sm:$0xff]  ;;  %v43_v10 = vld [vmem:[%s954_s1] sm:$0xff]  ;;  %v33_v15 = vld [vmem:[%s953_s0 + $0x30] sm:$0xff] }
   0x4   :  { %626 = vmatprep.subr.msk.bf16.mxu0 %vm779_vm1, %v624_v2  ;;  %v45_v11 = vld [vmem:[%s955_s2] sm:$0xff]  ;;  %604 = vmatprep.mubr.msk.f32.mxu0 %vm57_vm0, %v43_v10  ;;  %v46_v12 = vld [vmem:[%s955_s2 + $0x8] sm:$0x3]  ;;  %v636_v13 = vpack.c.bf16 %v32_v9, %v31_v8  ;;  %v34_v16 = vld [vmem:[%s953_s0 + $0x38] sm:$0xff] }
   0x5   :  { %629 = vmatpush3.bf16.xpose.msk.msra.mxu0 %vm779_vm1, %v624_v2  ;;  %49 = vperm.xlu0 %690, %v45_v11   ;;  %v294_v14 = vld [vmem:[%s959_s6] sm:$0xff]  ;;  %v296_v17 = vld [vmem:[%s959_s6 + $0x10] sm:$0xff]  ;;  %v642_v18 = vpack.c.bf16 %v34_v16, %v33_v15  ;;  %v36_v20 = vld [vmem:[%s953_s0 + $0x48] sm:$0xff] }
   0x6   :  { %632 = vmatprep.subr.msk.bf16.mxu0 %vm779_vm1, %v630_v7  ;;  %v35_v19 = vld [vmem:[%s953_s0 + $0x40] sm:$0xff]  ;;  %v37_v22 = vld [vmem:[%s953_s0 + $0x50] sm:$0xff]  ;;  %v38_v23 = vld [vmem:[%s953_s0 + $0x58] sm:$0xff] }
   0x7   :  { %v648_v21 = vpack.c.bf16 %v36_v20, %v35_v19  ;;  %v654_v24 = vpack.c.bf16 %v38_v23, %v37_v22  ;;  %v39_v25 = vld [vmem:[%s953_s0 + $0x60] sm:$0xff]  ;;  %v40_v26 = vld [vmem:[%s953_s0 + $0x68] sm:$0xff]  ;;  %v41_v28 = vld [vmem:[%s953_s0 + $0x70] sm:$0xff] }
   0x8   :  { %v660_v27 = vpack.c.bf16 %v40_v26, %v39_v25  ;;  %v42_v29 = vld [vmem:[%s953_s0 + $0x78] sm:$0xff]  ;;  %v44_v31 = vld [vmem:[%s954_s1 + $0x8] sm:$0x3]  ;;  %v189_v32 = vld [vmem:[%s956_s3] sm:$0xff] }
   0x9   :  { %54 = vperm.xlu0 %690, %v46_v12   ;;  %v666_v30 = vpack.c.bf16 %v42_v29, %v41_v28  ;;  %611 = vmatprep.mubr.msk.f32.mxu1 %vm57_vm0, %v189_v32  ;;  %v191_v33 = vld [vmem:[%s957_s4] sm:$0xff]  ;;  %v192_v34 = vld [vmem:[%s957_s4 + $0x8] sm:$0x3]  ;;  %v297_v36 = vld [vmem:[%s959_s6 + $0x18] sm:$0xff] }
   0xa   :  { %195 = vperm.xlu1 %691, %v191_v33   ;;  %v295_v35 = vld [vmem:[%s959_s6 + $0x8] sm:$0xff]  ;;  %vm893_vm4 = vmpackc.low %vm209_vm2, %vm727_vm3  ;;  %v290_v48 = vld [vmem:[%s958_s5] sm:$0xff] }
   0xb   :  { %v190_v47 = vld [vmem:[%s956_s3 + $0x8] sm:$0x3]  ;;  %v292_v59 = vld [vmem:[%s958_s5 + $0x10] sm:$0xff]  ;;  %v293_v60 = vld [vmem:[%s958_s5 + $0x18] sm:$0xff] }
   0xc   :  { %v291_v58 = vld [vmem:[%s958_s5 + $0x8] sm:$0xff] }
   0xd   :  { %635 = vmatpush3.bf16.xpose.msk.msra.mxu0 %vm779_vm1, %v630_v7  ;;  %300 = vperm.xlu0 %690, %v294_v14  }
   0xe   :  { %638 = vmatprep.subr.msk.bf16.mxu0 %vm779_vm1, %v636_v13  ;;  %200 = vperm.xlu1 %691, %v192_v34  }
  0x11   :  { %310 = vperm.xlu0 %690, %v296_v17  }
  0x12   :  { %305 = vperm.xlu1 %691, %v295_v35  }
  0x15   :  { %641 = vmatpush3.bf16.xpose.msk.msra.mxu0 %vm779_vm1, %v636_v13 }
  0x16   :  { %644 = vmatprep.subr.msk.bf16.mxu0 %vm779_vm1, %v642_v18  ;;  %315 = vperm.xlu1 %691, %v297_v36  }
  0x1d   :  { %647 = vmatpush3.bf16.xpose.msk.msra.mxu0 %vm779_vm1, %v642_v18 }
  0x1e   :  { %650 = vmatprep.subr.msk.bf16.mxu0 %vm779_vm1, %v648_v21 }
  0x25   :  { %653 = vmatpush3.bf16.xpose.msk.msra.mxu0 %vm779_vm1, %v648_v21 }
  0x26   :  { %656 = vmatprep.subr.msk.bf16.mxu0 %vm779_vm1, %v654_v24 }
  0x2d   :  { %659 = vmatpush3.bf16.xpose.msk.msra.mxu0 %vm779_vm1, %v654_v24 }
  0x2e   :  { %662 = vmatprep.subr.msk.bf16.mxu0 %vm779_vm1, %v660_v27 }
  0x35   :  { %665 = vmatpush3.bf16.xpose.msk.msra.mxu0 %vm779_vm1, %v660_v27 }
  0x36   :  { %668 = vmatprep.subr.msk.bf16.mxu0 %vm779_vm1, %v666_v30 }
  0x3d   :  { %671 = vmatpush3.bf16.xpose.msk.msra.mxu0 %vm779_vm1, %v666_v30 }
  0x44   :  { %605 = vmatmul.mubr.msk.f32.vlgmr.msra.gmra.mrb[0].mxu0 %vm57_vm0, %v44_v31 }
  0x84   :  { %v50_v37 = vpop.permute.xlu0 %49 }
  0x88   :  { %v55_v38 = vpop.permute.xlu0 %54 }
  0x89   :  { %v196_v49 = vpop.permute.xlu1 %195 }
  0x8c   :  { %v301_v62 = vpop.permute.xlu0 %300 }
  0x8d   :  { %v201_v50 = vpop.permute.xlu1 %200 }
  0x90   :  { %v311_v6 = vpop.permute.xlu0 %310 }
  0x91   :  { %v306_v61 = vpop.permute.xlu1 %305 }
  0x95   :  { %v316_v3 = vpop.permute.xlu1 %315 }
 0x117   :  { %v606_v39 = vpop.f32.mrb[0].mxu0 }
 0x118   :  { %v184_v40 = vadd.f32 %v606_v39, %v55_v38  ;;  %v178_v41 = vpop.f32.mrb[1].mxu0 }
 0x119   :  { %v179_v42 = vadd.f32 %v178_v41, %v50_v37 }
 0x11a   :  { %v188_v43 = vmax.f32 %v184_v40, 0.0 }
 0x11b   :  { %v187_v44 = vmax.f32 %v179_v42, 0.0 }
 0x11d   :  { %v672_v46 = vpack.c.bf16 %v188_v43, %v187_v44 }
 0x11f   :  { %674 = vmatprep.subr.msk.bf16.mxu1 %vm893_vm4, %v672_v46 }
 0x120   :  { %677 = vmatpush3.bf16.msk.msra.mxu1 %vm893_vm4, %v672_v46 }
 0x123   :  { %612 = vmatmul.mubr.msk.f32.vlgmr.msra.gmra.mrb[0].mxu1 %vm57_vm0, %v190_v47 }
 0x124   :  { %618 = vmatprep.mubr.msk.f32.mxu1 %vm57_vm0, %v290_v48 }
 0x1f6   :  { %v613_v51 = vpop.f32.mrb[0].mxu1 }
 0x1f7   :  { %v285_v52 = vadd.f32 %v613_v51, %v201_v50  ;;  %v279_v53 = vpop.f32.mrb[1].mxu1 }
 0x1f8   :  { %v280_v54 = vadd.f32 %v279_v53, %v196_v49 }
 0x1f9   :  { %v289_v55 = vmax.f32 %v285_v52, 0.0 }
 0x1fa   :  { %v288_v56 = vmax.f32 %v280_v54, 0.0 }
 0x1fc   :  { %v678_v57 = vpack.c.bf16 %v289_v55, %v288_v56 }
 0x1fe   :  { %680 = vmatprep.subr.msk.bf16.mxu1 %vm893_vm4, %v678_v57 }
 0x1ff   :  { %683 = vmatpush3.bf16.msk.msra.mxu1 %vm893_vm4, %v678_v57 }
 0x202   :  { %619 = vmatmul.mubr.msk.f32.vlgmr.msra.gmra.mrb[2].mxu1 %vm57_vm0, %v291_v58 }
 0x203   :  { %621 = vmatprep.mubr.msk.f32.mxu1 %vm57_vm0, %v292_v59 }
 0x206   :  { %622 = vmatmul.mubr.msk.f32.gmra.mrb[4].mxu1 %vm57_vm0, %v293_v60 }
 0x2d5   :  { %v620_v63 = vpop.f32.mrb[2].mxu1 }
 0x2d6   :  { %v405_v0 = vadd.f32 %v620_v63, %v306_v61  ;;  %v399_v1 = vpop.f32.mrb[3].mxu1 }
 0x2d7   :  { %v400_v2 = vadd.f32 %v399_v1, %v301_v62 }
 0x2d9   :  { %v418_v4 = vmax.f32 %v400_v2, %v405_v0  ;;  %v623_v5 = vpop.f32.mrb[4].mxu1 }
 0x2da   :  { %v415_v7 = vadd.f32 %v623_v5, %v316_v3  ;;  %v409_v8 = vpop.f32.mrb[5].mxu1 }
 0x2db   :  { %v410_v9 = vadd.f32 %v409_v8, %v311_v6 }
 0x2dd   :  { %v419_v10 = vmax.f32 %v410_v9, %v415_v7 }
 0x2df   :  { %v420_v11 = vmax.f32 %v418_v4, %v419_v10 }
 0x2e1   :  { %v421_v12 = vrot.slane %v420_v11, 4 }
 0x2e3   :  { %v422_v13 = vmax.f32 %v420_v11, %v421_v12 }
 0x2e5   :  { %v423_v14 = vrot.slane %v422_v13, 2 }
 0x2e7   :  { %v424_v15 = vmax.f32 %v422_v13, %v423_v14 }
 0x2e9   :  { %v425_v16 = vrot.slane %v424_v15, 1 }
 0x2eb   :  { %v426_v17 = vmax.f32 %v424_v15, %v425_v16 }
 0x2ed   :  { %v427_v18 = vsub.f32 %v400_v2, %v426_v17  ;;  %v428_v19 = vsub.f32 %v405_v0, %v426_v17  ;;  %v429_v20 = vsub.f32 %v410_v9, %v426_v17  ;;  %v430_v21 = vsub.f32 %v415_v7, %v426_v17 }
 0x2ef   :  { %v431_v22 = vmul.f32 1.442695, %v427_v18  ;;  %v433_v23 = vmul.f32 1.442695, %v428_v19  ;;  %v435_v24 = vmul.f32 1.442695, %v429_v20 }
 0x2f0   :  { %v437_v25 = vmul.f32 1.442695, %v430_v21 }
 0x2f1   :  { %692 = vpow2.f32 %v431_v22 }
 0x2f2   :  { %694 = vpow2.f32 %v433_v23 }
 0x2f3   :  { %696 = vpow2.f32 %v435_v24 }
 0x2f4   :  { %698 = vpow2.f32 %v437_v25 }
 0x2fb   :  { %v693_v26 = vpop.eup %692 }
 0x2fc   :  { %v695_v27 = vpop.eup %694 }
 0x2fd   :  { %v439_v28 = vadd.f32 %v695_v27, %v693_v26  ;;  %v697_v29 = vpop.eup %696 }
 0x2fe   :  { %v699_v31 = vpop.eup %698 }
 0x2ff   :  { %v440_v30 = vadd.f32 %v697_v29, %v439_v28 }
 0x301   :  { %v441_v32 = vadd.f32 %v699_v31, %v440_v30 }
 0x303   :  { %v442_v33 = vrot.slane %v441_v32, 4 }
 0x305   :  { %v443_v34 = vadd.f32 %v442_v33, %v441_v32 }
 0x307   :  { %v444_v35 = vrot.slane %v443_v34, 2 }
 0x309   :  { %v445_v36 = vadd.f32 %v444_v35, %v443_v34 }
 0x30b   :  { %v446_v37 = vrot.slane %v445_v36, 1 }
 0x30d   :  { %v447_v38 = vadd.f32 %v446_v37, %v445_v36 }
 0x30f   :  { %700 = vrcp.f32 %v447_v38 }
 0x319   :  { %v701_v39 = vpop.eup %700 }
 0x31a   :  { %v449_v40 = vmul.f32 %v701_v39, %v693_v26  ;;  %v450_v41 = vmul.f32 %v701_v39, %v695_v27  ;;  %v451_v42 = vmul.f32 %v701_v39, %v697_v29  ;;  %v452_v43 = vmul.f32 %v701_v39, %v699_v31 }
 0x31c   :  { %453 = vxpose.xlu0.b32.start [1/4] (short) %v449_v40, 128 }
 0x320   :  { %454 = vxpose.xlu0.b32.cont [2/4] (short) %v450_v41, 128 }
 0x324   :  { %455 = vxpose.xlu0.b32.cont [3/4] (short) %v451_v42, 128 }
 0x328   :  { %456 = vxpose.xlu0.b32.end [4/4] (short) %v452_v43, 128 }
 0x39c   :  { %v469_v44 = vpop.trf.xlu0 }
 0x39d   :  { %486 = vst.msk [vmem:[#allocation2] sm:$0xff] %vm485_vm5, %v469_v44 }
 0x3a0   :  { %v470_v45 = vpop.trf.xlu0 }
 0x3a1   :  { %487 = vst.msk [vmem:[#allocation2 + $0x8] sm:$0xff] %vm485_vm5, %v470_v45 }
 0x3a4   :  { %v471_v46 = vpop.trf.xlu0 }
 0x3a5   :  { %488 = vst.msk [vmem:[#allocation2 + $0x10] sm:$0xff] %vm485_vm5, %v471_v46 }
 0x3a8   :  { %v472_v47 = vpop.trf.xlu0 }
 0x3a9   :  { %489 = vst.msk [vmem:[#allocation2 + $0x18] sm:$0xff] %vm485_vm5, %v472_v47 }
 0x3ac   :  { %v473_v48 = vpop.trf.xlu0 }
 0x3ad   :  { %490 = vst.msk [vmem:[#allocation2 + $0x20] sm:$0xff] %vm485_vm5, %v473_v48 }
 0x3b0   :  { %v474_v49 = vpop.trf.xlu0 }
 0x3b1   :  { %491 = vst.msk [vmem:[#allocation2 + $0x28] sm:$0xff] %vm485_vm5, %v474_v49 }
 0x3b4   :  { %v475_v50 = vpop.trf.xlu0 }
 0x3b5   :  { %492 = vst.msk [vmem:[#allocation2 + $0x30] sm:$0xff] %vm485_vm5, %v475_v50 }
 0x3b8   :  { %v476_v51 = vpop.trf.xlu0 }
 0x3b9   :  { %493 = vst.msk [vmem:[#allocation2 + $0x38] sm:$0xff] %vm485_vm5, %v476_v51 }
 0x3bc   :  { %v477_v52 = vpop.trf.xlu0 }
 0x3bd   :  { %494 = vst.msk [vmem:[#allocation2 + $0x40] sm:$0xff] %vm485_vm5, %v477_v52 }
 0x3c0   :  { %v478_v53 = vpop.trf.xlu0 }
 0x3c1   :  { %495 = vst.msk [vmem:[#allocation2 + $0x48] sm:$0xff] %vm485_vm5, %v478_v53 }
 0x3c4   :  { %v479_v54 = vpop.trf.xlu0 }
 0x3c5   :  { %496 = vst.msk [vmem:[#allocation2 + $0x50] sm:$0xff] %vm485_vm5, %v479_v54 }
 0x3c8   :  { %v480_v55 = vpop.trf.xlu0 }
 0x3c9   :  { %497 = vst.msk [vmem:[#allocation2 + $0x58] sm:$0xff] %vm485_vm5, %v480_v55 }
 0x3cc   :  { %v481_v56 = vpop.trf.xlu0 }
 0x3cd   :  { %498 = vst.msk [vmem:[#allocation2 + $0x60] sm:$0xff] %vm485_vm5, %v481_v56 }
 0x3d0   :  { %v482_v57 = vpop.trf.xlu0 }
 0x3d1   :  { %499 = vst.msk [vmem:[#allocation2 + $0x68] sm:$0xff] %vm485_vm5, %v482_v57 }
 0x3d4   :  { %v483_v58 = vpop.trf.xlu0 }
 0x3d5   :  { %500 = vst.msk [vmem:[#allocation2 + $0x70] sm:$0xff] %vm485_vm5, %v483_v58 }
 0x3d8   :  { %v484_v59 = vpop.trf.xlu0 }
 0x3d9   :  { %501 = vst.msk [vmem:[#allocation2 + $0x78] sm:$0xff] %vm485_vm5, %v484_v59 }
 0x3da   :  { %506 = vsyncadd [#allocation3], 1920  ;;  %s728_s5 = smov [#allocation2]  }
 0x3db   :  { %s507_s12 = sshll.u32 %s728_s5, 4  ;;  %s508_s12 = int_to_ptr.vmem [resolvable:$true] %s507_s12 }
 0x3dc   :  { %s702_s13 = scalar_lea.vmem %s508_s12, 128  ;;  %s706_s14 = scalar_lea.vmem %s508_s12, 2048 }
 0x3dd   :  { %p703_p0 = scmp.ne.s32.totalorder %s508_s12, %s702_s13  ;;  %p707_p1 = scmp.lt.s32.totalorder %s508_s12, %s508_s12 }
 0x3de   :  { %p708_p2 = scmp.lt.s32.totalorder %s706_s14, %s702_s13 }
 0x3e0   :  { %p709_p3 = por %p708_p2, %p707_p1 }
 0x3e2   :  { %p710_p4 = pnand %p709_p3, %p703_p0 }
 0x3e4   :  { %713 = shalt.err (!%p710_p4)
}
 0x3e5   :  { %s714_s17 = scalar_lea.hbm %s960_s7, 128 }
 0x3e6   :  { %p715_p5 = scmp.ne.s32.totalorder %s960_s7, %s714_s17  ;;  %p718_p6 = scmp.lt.u32.totalorder %s714_s17, %s960_s7 }
 0x3e8   :  { %p720_p7 = pnand %p718_p6, %p715_p5 }
 0x3ea   :  { %723 = shalt.err (!%p720_p7)
}
 0x3eb   :  { %s729_s22 = smov 128   ;;  %s730_s0 = smov 8  }
 0x3ec   :  { %513 = dma.vmem_to_hbm [thread:$0]  %s508_s12, 128, %s960_s7, [#allocation3], %s729_s22, %s729_s22, %s730_s0  }
 0x3ed   :  { %724 = dma.done.wait [#allocation3], 2048  }
 0x3ee   :  { %725 = vsyncadd [#allocation3], 4294965248 }
 0x3ef   :  { %517 = vsyncpa [#allocation3], 1 }

</bundles_post_ra>
